<compile_context>
chip_gen: v7x
topology: tpu7x:2x2x1
jax: 0.10.0
libtpu: 0.0.40
codegen_flags: <defaults>
</compile_context>

<pallas_src>
import functools

import jax
import jax.numpy as jnp
from jax.experimental import pallas as pl
from jax.experimental.pallas import tpu as pltpu


_LANES = 128
_MIN_GRID_STEPS = 4                      # let v7x's 2 TensorCores both get work
_DEFAULT_BLOCK_BYTES = 2 * 1024 * 1024   # 8 MiB pipeline footprint -> safe on v5e
_BIG_BLOCK_BYTES = 4 * 1024 * 1024       # 16 MiB footprint -> fits v6e/v7x 32 MiB scope


def _round_up(a: int, m: int) -> int:
    return ((a + m - 1) // m) * m


def _target_block_bytes() -> int:
    """Per-generation block byte budget (in + out, double-buffered => 4x this)."""
    try:
        kind = jax.devices()[0].device_kind.lower()
    except Exception:
        return _DEFAULT_BLOCK_BYTES
    if "v6" in kind or "v7" in kind:
        return _BIG_BLOCK_BYTES
    return _DEFAULT_BLOCK_BYTES


def _act_f32(xf, activation, beta=None):
    """Activation math on an f32 array (shared by kernel and jnp tail path)."""
    if activation == "swish":
        return xf * jax.nn.sigmoid(beta * xf)
    if activation == "gelu":
        # PyTorch module uses the sigmoid approximation, NOT erf-GELU.
        return xf * jax.nn.sigmoid(1.702 * xf)
    if activation == "mish":
        # x * tanh(softplus(x)) == x * w/(w+2), w = e^x*(e^x+2): 1 exp + 1 div.
        e = jnp.exp(xf)
        w = e * (e + 2.0)
        return jnp.where(xf > 20.0, xf, xf * (w / (w + 2.0)))
    if activation == "sigmoid":
        return jax.nn.sigmoid(xf)
    if activation == "tanh":
        return jnp.tanh(xf)
    if activation == "elu":
        return jnp.where(xf > 0, xf, jnp.expm1(xf))
    if activation == "softplus":
        return jax.nn.softplus(xf)
    raise NotImplementedError(f"activation '{activation}' not supported")


def _act_jnp(x, activation, beta):
    """Plain-jnp path for the <128-element ragged tail / tiny tensors."""
    if activation == "identity":
        return x
    if activation == "relu":
        return jnp.maximum(x, jnp.zeros_like(x))
    if activation == "leaky_relu":
        return jnp.where(x > 0, x, jnp.asarray(0.01, x.dtype) * x)
    b = beta[0].astype(jnp.float32) if activation == "swish" else None
    return _act_f32(x.astype(jnp.float32), activation, b).astype(x.dtype)


def _act_kernel(x_ref, o_ref, *, activation: str):
    """Elementwise activation on one (block_rows, 128) VMEM tile (no beta)."""
    x = x_ref[...]
    if activation == "relu":
        o_ref[...] = jnp.maximum(x, jnp.zeros_like(x))
    elif activation == "leaky_relu":
        # Cheap VPU op: keep the native dtype, no f32 upcast.
        o_ref[...] = jnp.where(x > 0, x, jnp.asarray(0.01, x.dtype) * x)
    else:
        y = _act_f32(x.astype(jnp.float32), activation)
        o_ref[...] = y.astype(o_ref.dtype)


def _swish_kernel(beta_ref, x_ref, o_ref):
    """swish: x * sigmoid(beta * x); beta is an SMEM scalar."""
    beta = beta_ref[0]
    xf = x_ref[...].astype(jnp.float32)
    o_ref[...] = _act_f32(xf, "swish", beta).astype(o_ref.dtype)


@functools.partial(jax.jit, static_argnames=("activation", "block_bytes"))
def _activation_forward(x, beta, *, activation: str, block_bytes: int):
    if activation == "identity":
        return x  # free: no HBM pass at all

    orig_shape = x.shape
    dtype = x.dtype
    n = x.size
    if n == 0:
        return x

    itemsize = x.dtype.itemsize
    # Sublane packing multiple: 8 (f32) / 16 (bf16) / 32 (int8, fp8).
    sub_mult = max(8, 8 * (4 // max(1, itemsize)))

    rows_total = n // _LANES           # full 128-lane rows
    tail = n - rows_total * _LANES     # < 128 leftover elements
    flat = x.reshape(-1)

    # Tiny tensors (< one lane row): skip the kernel entirely.
    if rows_total == 0:
        return _act_jnp(flat, activation, beta).reshape(orig_shape)

    x2d = flat[: rows_total * _LANES].reshape(rows_total, _LANES)

    # Constant-BYTE blocks (dtype aware) so bf16/int8 keep multi-MiB DMAs.
    max_rows = max(sub_mult, block_bytes // (_LANES * itemsize))
    if rows_total > max_rows:
        block_rows = max_rows
    elif rows_total >= 2 * sub_mult * _MIN_GRID_STEPS:
        # Whole slab fits one block: split anyway so v7x megacore gets >=2 steps.
        block_rows = _round_up(pl.cdiv(rows_total, _MIN_GRID_STEPS), sub_mult)
    else:
        block_rows = rows_total

    grid = (pl.cdiv(rows_total, block_rows),)
    block_spec = pl.BlockSpec((block_rows, _LANES), lambda i: (i, 0))

    if activation == "swish":
        kernel = _swish_kernel
        in_specs = [
            pl.BlockSpec(memory_space=pltpu.SMEM),  # beta scalar
            block_spec,
        ]
        args = (beta.astype(jnp.float32), x2d)
    else:
        kernel = functools.partial(_act_kernel, activation=activation)
        in_specs = [block_spec]
        args = (x2d,)

    out2d = pl.pallas_call(
        kernel,
        out_shape=jax.ShapeDtypeStruct((rows_total, _LANES), dtype),
        grid=grid,
        in_specs=in_specs,
        out_specs=block_spec,
        compiler_params=pltpu.CompilerParams(
            dimension_semantics=("parallel",)
        ),
    )(*args)

    out_flat = out2d.reshape(-1)
    if tail:
        # Ragged suffix (< 128 elems): tiny jnp compute + one concat, replacing
        # the old whole-tensor pad -> kernel -> slice (two full extra HBM passes).
        out_tail = _act_jnp(flat[rows_total * _LANES:], activation, beta)
        out_flat = jnp.concatenate([out_flat, out_tail])
    return out_flat.reshape(orig_shape)


class Activation:
    """JAX/Pallas port of the PyTorch `Activation` nn.Module.

    Note: 'gelu' matches the module's sigmoid approximation x*sigmoid(1.702x),
    not exact GELU.
    """

    def __init__(self, activation: str):
        self.activation = activation.lower()
        # nn.Parameter(torch.ones(1)) equivalent (only used for 'swish').
        # TODO(synk): parameter training (requires_grad) is out of scope here.
        self.beta = jnp.ones((1,), dtype=jnp.float32)

    def __call__(self, x):
        return _activation_forward(
            x, self.beta,
            activation=self.activation,
            block_bytes=_target_block_bytes(),
        )


def _reference(activation, x, beta):
    activation = activation.lower()
    if activation == "identity":
        return x
    if activation == "relu":
        return jnp.maximum(x, jnp.zeros_like(x))
    if activation == "leaky_relu":
        return jnp.where(x > 0, x, jnp.asarray(0.01, x.dtype) * x)
    xf = x.astype(jnp.float32)
    if activation == "swish":
        y = xf * jax.nn.sigmoid(beta[0] * xf)
    elif activation == "gelu":
        y = xf * jax.nn.sigmoid(1.702 * xf)
    elif activation == "mish":
        y = xf * jnp.tanh(jax.nn.softplus(xf))
    elif activation == "sigmoid":
        y = jax.nn.sigmoid(xf)
    elif activation == "tanh":
        y = jnp.tanh(xf)
    elif activation == "elu":
        y = jnp.where(xf > 0, xf, jnp.expm1(xf))
    elif activation == "softplus":
        y = jax.nn.softplus(xf)
    else:
        raise NotImplementedError(activation)
    return y.astype(x.dtype)


if __name__ == "__main__":
    key = jax.random.PRNGKey(0)
    ok = True

    # Main NCHW-like f32 input (lane-aligned: 2048 elements -> single-block path).
    x_f32 = jax.random.normal(key, (2, 4, 16, 16), dtype=jnp.float32)
    acts = ["gelu", "swish", "mish", "tanh", "sigmoid", "relu", "identity",
            "elu", "softplus", "leaky_relu"]
    for act in acts:
        mod = Activation(act)
        y = jax.block_until_ready(mod(x_f32))
        y_ref = _reference(act, x_f32, mod.beta)
        if y.shape != x_f32.shape or y.dtype != x_f32.dtype:
            ok = False
            break
        if not jnp.allclose(y, y_ref, atol=1e-5, rtol=1e-5):
            ok = False
            break

    # Moderate f32 input (8192 elements -> 64 rows -> multi-step grid / split path).
    if ok:
        x_mid = jax.random.normal(jax.random.PRNGKey(3), (2, 4, 32, 32),
                                  dtype=jnp.float32)
        for act in ["gelu", "mish", "swish"]:
            mod = Activation(act)
            y = jax.block_until_ready(mod(x_mid))
            y_ref = _reference(act, x_mid, mod.beta)
            if y.shape != x_mid.shape or not jnp.allclose(
                    y, y_ref, atol=1e-5, rtol=1e-5):
                ok = False
                break

    # Tiny ragged shape (105 elements -> pure-jnp tail-only path).
    if ok:
        x_tiny = jax.random.normal(jax.random.PRNGKey(1), (3, 5, 7),
                                   dtype=jnp.float32)
        for act in ["gelu", "swish"]:
            mod = Activation(act)
            y = jax.block_until_ready(mod(x_tiny))
            y_ref = _reference(act, x_tiny, mod.beta)
            if y.shape != x_tiny.shape or not jnp.allclose(
                    y, y_ref, atol=1e-5, rtol=1e-5):
                ok = False
                break

    # Ragged shape >128 elements (1050 -> aligned prefix through kernel + jnp tail).
    if ok:
        x_rag = jax.random.normal(jax.random.PRNGKey(4), (3, 50, 7),
                                  dtype=jnp.float32)
        for act in ["gelu", "swish", "relu"]:
            mod = Activation(act)
            y = jax.block_until_ready(mod(x_rag))
            y_ref = _reference(act, x_rag, mod.beta)
            if y.shape != x_rag.shape or not jnp.allclose(
                    y, y_ref, atol=1e-5, rtol=1e-5):
                ok = False
                break

    # bf16 input (kernel computes in f32, stores bf16; dtype-aware block rows).
    if ok:
        x_bf16 = jax.random.normal(jax.random.PRNGKey(2), (2, 4, 16, 16),
                                   dtype=jnp.bfloat16)
        for act in ["gelu", "relu", "mish"]:
            mod = Activation(act)
            y = jax.block_until_ready(mod(x_bf16))
            y_ref = _reference(act, x_bf16, mod.beta)
            if (y.shape != x_bf16.shape or y.dtype != jnp.bfloat16 or
                    not jnp.allclose(y.astype(jnp.float32),
                                     y_ref.astype(jnp.float32),
                                     atol=1e-2, rtol=1e-2)):
                ok = False
                break

    if ok:
        print("KERNEL_OK")
    else:
        print("KERNEL_MISMATCH")
</pallas_src>

<mosaic_0001>
module attributes {stable_mosaic.version = 11 : i64} {
  func.func @_act_kernel(%arg0: i32, %arg1: memref<16x128xf32, #tpu.memory_space<vmem>>, %arg2: memref<16x128xf32, #tpu.memory_space<vmem>>) attributes {dimension_semantics = [#tpu.dimension_semantics<parallel>], iteration_bounds = array<i64: 1>, scalar_prefetch = 0 : i64, scratch_operands = 0 : i64, tpu.core_type = #tpu.core_type<tc>, window_params = [{transform_indices = @transform_0, window_bounds = array<i64: 16, 128>}, {transform_indices = @transform_1, window_bounds = array<i64: 16, 128>}]} {
    %c0 = arith.constant 0 : index
    %c0_0 = arith.constant 0 : index
    %0 = vector.load %arg1[%c0, %c0_0] : memref<16x128xf32, #tpu.memory_space<vmem>>, vector<16x128xf32>
    %cst = arith.constant 1.702000e+00 : f32
    %1 = vector.broadcast %cst : f32 to vector<16x128xf32>
    %2 = arith.mulf %1, %0 : vector<16x128xf32>
    %3 = arith.negf %2 : vector<16x128xf32>
    %4 = math.exp %3 : vector<16x128xf32>
    %cst_1 = arith.constant 1.000000e+00 : f32
    %5 = vector.broadcast %cst_1 : f32 to vector<16x128xf32>
    %6 = arith.addf %5, %4 : vector<16x128xf32>
    %7 = arith.divf %5, %6 : vector<16x128xf32>
    %8 = arith.mulf %0, %7 : vector<16x128xf32>
    %c0_2 = arith.constant 0 : index
    %c0_3 = arith.constant 0 : index
    %9 = vector.load %arg2[%c0_2, %c0_3] : memref<16x128xf32, #tpu.memory_space<vmem>>, vector<16x128xf32>
    tpu.vector_store %arg2[%c0_2, %c0_3], %8 {strides = array<i32>} : memref<16x128xf32, #tpu.memory_space<vmem>>, vector<16x128xf32>,
    return
  }
  func.func @transform_0(%arg0: i32) -> (i32, i32) {
    %c0_i32 = arith.constant 0 : i32
    %c0_i32_0 = arith.constant 0 : i32
    return %arg0, %c0_i32 : i32, i32
  }
  func.func @transform_1(%arg0: i32) -> (i32, i32) {
    %c0_i32 = arith.constant 0 : i32
    %c0_i32_0 = arith.constant 0 : i32
    return %arg0, %c0_i32 : i32, i32
  }
}

</mosaic_0001>

<bundles_post_ra>
// kernel: _activation_forward.1
= control target key start
LH: loop header
LB: loop body
LE: loop exit
PB: predicated region body
PF: predicated region fallthrough
CT: control target
= control target key end

     0   :  { %s64_s0 = inlined_call_operand.vmem [shape: f32[16,128], index: 0, kind: input, shape index: {}]   ;;  %s65_s1 = inlined_call_operand.vmem [shape: f32[16,128], index: 1, kind: output, shape index: {}]  }
   0x1   :  { %v8_v0 = vld [vmem:[%s64_s0] sm:$0xff]  ;;  %v9_v1 = vld [vmem:[%s64_s0 + $0x8] sm:$0xff] }
   0x2   :  { %v32_v2 = vmul.f32 -1.702, %v8_v0  ;;  %v33_v3 = vmul.f32 -1.702, %v9_v1 }
   0x4   :  { %v14_v4 = vmul.f32 1.442695, %v32_v2  ;;  %v16_v5 = vmul.f32 1.442695, %v33_v3 }
   0x6   :  { %34 = vpow2.f32 %v14_v4 }
   0x7   :  { %36 = vpow2.f32 %v16_v5 }
  0x10   :  { %v35_v6 = vpop.eup %34 }
  0x11   :  { %v37_v7 = vpop.eup %36  ;;  %v18_v8 = vadd.f32 1.0, %v35_v6 }
  0x12   :  { %v19_v9 = vadd.f32 1.0, %v37_v7 }
  0x13   :  { %38 = vrcp.f32 %v18_v8 }
  0x14   :  { %40 = vrcp.f32 %v19_v9 }
  0x1d   :  { %v39_v10 = vpop.eup %38 }
  0x1e   :  { %v41_v11 = vpop.eup %40  ;;  %v24_v12 = vmul.f32 %v39_v10, %v8_v0 }
  0x1f   :  { %v25_v13 = vmul.f32 %v41_v11, %v9_v1 }
  0x20   :  { %26 = vst [vmem:[%s65_s1] sm:$0xff] %v24_v12 }
  0x21   :  { %27 = vst [vmem:[%s65_s1 + $0x8] sm:$0xff] %v25_v13 }

</bundles_post_ra>
